<compile_context>
chip_gen: v7x
topology: tpu7x:2x2x1
jax: 0.10.0
libtpu: 0.0.40
codegen_flags: <defaults>
</compile_context>

<pallas_src>
import functools

import jax
import jax.numpy as jnp
from jax.experimental import pallas as pl
from jax.experimental.pallas import tpu as pltpu

EPS = 1e-5  # nn.InstanceNorm1d default


def adain_kernel(x_ref, gb_ref, o_ref, *, valid_t):
    # x_ref:  (1, tc, T_pad)  one (batch, channel-tile) slab
    # gb_ref: (1, tc, 2)      [..., 0] = 1 + gamma, [..., 1] = beta
    x = x_ref[...].astype(jnp.float32)
    gb = gb_ref[...].astype(jnp.float32)
    g1 = gb[:, :, 0:1]          # (1, tc, 1)  == 1 + gamma
    beta = gb[:, :, 1:2]        # (1, tc, 1)

    t_pad = x.shape[2]
    inv_t = 1.0 / valid_t

    # Two-pass stats in f32 (matches PyTorch's formulation; avoids the
    # E[x^2]-E[x]^2 cancellation issue).  Padded tail columns are zero on
    # input, so the raw sum is already exact; the centered pass is masked.
    mean = jnp.sum(x, axis=2, keepdims=True) * inv_t
    if t_pad == valid_t:
        centered = x - mean
    else:
        mask = jax.lax.broadcasted_iota(jnp.int32, x.shape, 2) < valid_t
        centered = jnp.where(mask, x - mean, 0.0)
    var = jnp.sum(centered * centered, axis=2, keepdims=True) * inv_t

    # Fused affine: one FMA per element instead of sub/rsqrt-mul/mul/add.
    scale = g1 * jax.lax.rsqrt(var + EPS)     # (1, tc, 1)
    shift = beta - scale * mean               # (1, tc, 1)
    o_ref[...] = (x * scale + shift).astype(o_ref.dtype)


def _round_up(n, m):
    return ((n + m - 1) // m) * m


def _sublane_min(dtype):
    """Native sublane multiple for packed dtypes: f32->8, bf16->16, int8->32."""
    return {4: 8, 2: 16, 1: 32}.get(jnp.dtype(dtype).itemsize, 8)


def _vmem_capacity_bytes():
    """Per-core VMEM capacity; conservative 64 MiB (v7x) if query unavailable."""
    try:
        info = pltpu.get_tpu_info()
        cap = getattr(info, "vmem_capacity_bytes", None)
        if cap:
            return int(cap)
    except Exception:
        pass
    return 64 * 1024 * 1024


def _choose_tc(c_pad, t_pad, itemsize, sub, target_block_bytes, batch):
    """Largest channel tile tc (multiple of sub, divides c_pad) such that the
    block fits the budget and the grid exposes >= 2 steps (megacore)."""
    row_bytes = t_pad * itemsize
    cands = [tc for tc in range(sub, c_pad + 1, sub) if c_pad % tc == 0]
    fit = [tc for tc in cands if tc * row_bytes <= target_block_bytes]
    pool = fit if fit else [cands[0]]  # at least the minimum-height tile
    # Keep >= 2 grid steps so both v7x TensorCores get work.
    both_cores = [tc for tc in pool if batch * (c_pad // tc) >= 2]
    pool = both_cores if both_cores else pool
    return max(pool)


def adain(x, style, fc_w, fc_b):
    """x: (B, C, T), style: (B, S), fc_w: (2C, S), fc_b: (2C,) -> (B, C, T)."""
    B, C, T = x.shape
    dtype = x.dtype
    itemsize = jnp.dtype(dtype).itemsize
    sub = _sublane_min(dtype)

    # Hoisted fc: one batched matmul in XLA (uses the MXU properly).  Fuse
    # gamma/beta into a single (B, C, 2) side-input with (1 + gamma) folded in.
    h = (style.astype(jnp.float32) @ fc_w.astype(jnp.float32).T
         + fc_b.astype(jnp.float32))                       # (B, 2C)
    gamma = h[:, :C]
    beta = h[:, C:]
    gb = jnp.stack([1.0 + gamma, beta], axis=-1)           # (B, C, 2) f32

    # Pad for clean tiling: C to the sublane multiple, T to a lane multiple so
    # loads/stores are lane-dense (no masked vst.msk on the output path).
    C_pad = _round_up(C, sub)
    T_pad = _round_up(T, 128)
    padded = (C_pad, T_pad) != (C, T)
    x_p = jnp.pad(x, ((0, 0), (0, C_pad - C), (0, T_pad - T))) if padded else x
    if C_pad != C:
        gb = jnp.pad(gb, ((0, 0), (0, C_pad - C), (0, 0)))

    # Generation-aware VMEM budget: ~4 MiB blocks / 48 MiB limit on v7x
    # (64 MiB per TC), ~8 MiB blocks / 96 MiB limit on v5e/v6e (128 MiB).
    cap = _vmem_capacity_bytes()
    target_block_bytes = max(1 << 20, cap // 16)
    # TODO(synk): for extreme T where even a sublane-minimum slab exceeds the
    # block budget, split T with an "arbitrary" grid axis + stats accumulators
    # (two-pass over T) instead of keeping T unsplit per block.
    tc = _choose_tc(C_pad, T_pad, itemsize, sub, target_block_bytes, B)
    block_bytes = tc * T_pad * itemsize
    # Cover double-buffered in/out blocks plus f32 temporaries, capped at 75%
    # of physical VMEM (never request the whole core's VMEM on v7x).
    vmem_limit = int(min(cap * 3 // 4, max(cap // 2, 6 * block_bytes)))

    grid = (B, C_pad // tc)
    kernel = functools.partial(adain_kernel, valid_t=T)

    out_p = pl.pallas_call(
        kernel,
        out_shape=jax.ShapeDtypeStruct((B, C_pad, T_pad), dtype),
        grid_spec=pltpu.PrefetchScalarGridSpec(
            num_scalar_prefetch=0,
            grid=grid,
            in_specs=[
                pl.BlockSpec((1, tc, T_pad), lambda b, c: (b, c, 0)),
                pl.BlockSpec((1, tc, 2), lambda b, c: (b, c, 0)),
            ],
            out_specs=pl.BlockSpec((1, tc, T_pad), lambda b, c: (b, c, 0)),
        ),
        compiler_params=pltpu.CompilerParams(
            dimension_semantics=("parallel", "parallel"),
            vmem_limit_bytes=vmem_limit,
        ),
    )(x_p, gb)

    if padded:
        out_p = out_p[:, :C, :T]
    return out_p


def adain_ref(x, style, fc_w, fc_b):
    """Pure-JAX reference matching the PyTorch forward exactly."""
    h = style @ fc_w.T + fc_b                      # (B, 2C)
    C = x.shape[1]
    gamma = h[:, :C][:, :, None]                   # (B, C, 1)
    beta = h[:, C:][:, :, None]                    # (B, C, 1)
    mean = jnp.mean(x, axis=2, keepdims=True)
    var = jnp.mean((x - mean) ** 2, axis=2, keepdims=True)
    x_norm = (x - mean) / jnp.sqrt(var + EPS)
    return (1 + gamma) * x_norm + beta


if __name__ == "__main__":
    B, C, T = 2, 4, 16          # batch, num_features, sequence length
    style_dim = 8

    key = jax.random.PRNGKey(0)
    kx, ks, kw, kb = jax.random.split(key, 4)

    x = jax.random.normal(kx, (B, C, T), dtype=jnp.float32)
    style = jax.random.normal(ks, (B, style_dim), dtype=jnp.float32)

    # Synthetic fc parameters (PyTorch Linear: weight (2C, S), bias (2C,))
    bound = 1.0 / (style_dim ** 0.5)
    fc_w = jax.random.uniform(kw, (2 * C, style_dim), jnp.float32, -bound, bound)
    fc_b = jax.random.uniform(kb, (2 * C,), jnp.float32, -bound, bound)

    out = adain(x, style, fc_w, fc_b)
    out = jax.block_until_ready(out)

    ref = adain_ref(x, style, fc_w, fc_b)
    assert out.shape == (B, C, T)
    assert jnp.allclose(out, ref, atol=1e-4, rtol=1e-4), "mismatch vs reference"

    print("KERNEL_OK")
</pallas_src>

<mosaic_0001>
module attributes {stable_mosaic.version = 11 : i64} {
  func.func @adain_kernel(%arg0: i32, %arg1: i32, %arg2: memref<1x8x128xf32, #tpu.memory_space<vmem>>, %arg3: memref<1x8x2xf32, #tpu.memory_space<vmem>>, %arg4: memref<1x8x128xf32, #tpu.memory_space<vmem>>) attributes {dimension_semantics = [#tpu.dimension_semantics<parallel>, #tpu.dimension_semantics<parallel>], iteration_bounds = array<i64: 2, 1>, scalar_prefetch = 0 : i64, scratch_operands = 0 : i64, tpu.core_type = #tpu.core_type<tc>, window_params = [{transform_indices = @transform_0, window_bounds = array<i64: 1, 8, 128>}, {transform_indices = @transform_1, window_bounds = array<i64: 1, 8, 2>}, {transform_indices = @transform_2, window_bounds = array<i64: 1, 8, 128>}]} {
    %c0 = arith.constant 0 : index
    %c0_0 = arith.constant 0 : index
    %c0_1 = arith.constant 0 : index
    %0 = vector.load %arg2[%c0, %c0_0, %c0_1] : memref<1x8x128xf32, #tpu.memory_space<vmem>>, vector<1x8x128xf32>
    %c0_2 = arith.constant 0 : index
    %c0_3 = arith.constant 0 : index
    %c0_4 = arith.constant 0 : index
    %1 = vector.load %arg3[%c0_2, %c0_3, %c0_4] : memref<1x8x2xf32, #tpu.memory_space<vmem>>, vector<1x8x2xf32>
    %2 = vector.extract_strided_slice %1 {offsets = [0, 0, 0], sizes = [1, 8, 1], strides = [1, 1, 1]} : vector<1x8x2xf32> to vector<1x8x1xf32>
    %3 = vector.extract_strided_slice %1 {offsets = [0, 0, 1], sizes = [1, 8, 1], strides = [1, 1, 1]} : vector<1x8x2xf32> to vector<1x8x1xf32>
    %cst = arith.constant dense<0.000000e+00> : vector<1x8xf32>
    %4 = vector.multi_reduction <add>, %0, %cst [2] : vector<1x8x128xf32> to vector<1x8xf32>
    %5 = vector.shape_cast %4 : vector<1x8xf32> to vector<1x8x1xf32>
    %cst_5 = arith.constant 6.250000e-02 : f32
    %6 = vector.broadcast %cst_5 : f32 to vector<1x8x1xf32>
    %7 = arith.mulf %5, %6 : vector<1x8x1xf32>
    %8 = tpu.iota {dimensions = array<i32: 2>} : vector<1x8x128xi32>
    %c16_i32 = arith.constant 16 : i32
    %9 = vector.broadcast %c16_i32 : i32 to vector<1x8x128xi32>
    %10 = arith.cmpi slt, %8, %9 : vector<1x8x128xi32>
    %11 = vector.broadcast %7 : vector<1x8x1xf32> to vector<1x8x128xf32>
    %12 = arith.subf %0, %11 : vector<1x8x128xf32>
    %cst_6 = arith.constant 0.000000e+00 : f32
    %13 = vector.broadcast %cst_6 : f32 to vector<1x8x128xf32>
    %14 = arith.select %10, %12, %13 : vector<1x8x128xi1>, vector<1x8x128xf32>
    %15 = arith.mulf %14, %14 : vector<1x8x128xf32>
    %cst_7 = arith.constant dense<0.000000e+00> : vector<1x8xf32>
    %16 = vector.multi_reduction <add>, %15, %cst_7 [2] : vector<1x8x128xf32> to vector<1x8xf32>
    %17 = vector.shape_cast %16 : vector<1x8xf32> to vector<1x8x1xf32>
    %cst_8 = arith.constant 6.250000e-02 : f32
    %18 = vector.broadcast %cst_8 : f32 to vector<1x8x1xf32>
    %19 = arith.mulf %17, %18 : vector<1x8x1xf32>
    %cst_9 = arith.constant 9.99999974E-6 : f32
    %20 = vector.broadcast %cst_9 : f32 to vector<1x8x1xf32>
    %21 = arith.addf %19, %20 : vector<1x8x1xf32>
    %22 = math.rsqrt %21 : vector<1x8x1xf32>
    %23 = arith.mulf %2, %22 : vector<1x8x1xf32>
    %24 = arith.mulf %23, %7 : vector<1x8x1xf32>
    %25 = arith.subf %3, %24 : vector<1x8x1xf32>
    %26 = vector.broadcast %23 : vector<1x8x1xf32> to vector<1x8x128xf32>
    %27 = arith.mulf %0, %26 : vector<1x8x128xf32>
    %28 = vector.broadcast %25 : vector<1x8x1xf32> to vector<1x8x128xf32>
    %29 = arith.addf %27, %28 : vector<1x8x128xf32>
    %c0_10 = arith.constant 0 : index
    %c0_11 = arith.constant 0 : index
    %c0_12 = arith.constant 0 : index
    %30 = vector.load %arg4[%c0_10, %c0_11, %c0_12] : memref<1x8x128xf32, #tpu.memory_space<vmem>>, vector<1x8x128xf32>
    tpu.vector_store %arg4[%c0_10, %c0_11, %c0_12], %29 {strides = array<i32>} : memref<1x8x128xf32, #tpu.memory_space<vmem>>, vector<1x8x128xf32>,
    return
  }
  func.func @transform_0(%arg0: i32, %arg1: i32) -> (i32, i32, i32) {
    %c0_i32 = arith.constant 0 : i32
    %c0_i32_0 = arith.constant 0 : i32
    return %arg0, %arg1, %c0_i32 : i32, i32, i32
  }
  func.func @transform_1(%arg0: i32, %arg1: i32) -> (i32, i32, i32) {
    %c0_i32 = arith.constant 0 : i32
    %c0_i32_0 = arith.constant 0 : i32
    return %arg0, %arg1, %c0_i32 : i32, i32, i32
  }
  func.func @transform_2(%arg0: i32, %arg1: i32) -> (i32, i32, i32) {
    %c0_i32 = arith.constant 0 : i32
    %c0_i32_0 = arith.constant 0 : i32
    return %arg0, %arg1, %c0_i32 : i32, i32, i32
  }
}

</mosaic_0001>

<bundles_post_ra>
// kernel: tpu_custom_call.1
= control target key start
LH: loop header
LB: loop body
LE: loop exit
PB: predicated region body
PF: predicated region fallthrough
CT: control target
= control target key end

     0   :  { %7 = vsyncpa [#allocation3], 0  ;;  %s617_s0 = inlined_call_operand.vmem [shape: f32[2,8,128], index: 0, kind: input, shape index: {}]   ;;  %s618_s1 = inlined_call_operand.vmem [shape: f32[2,8,2], index: 1, kind: input, shape index: {}]   ;;  %s619_s2 = inlined_call_operand.hbm [shape: f32[2,8,128], index: 2, kind: output, shape index: {}]  }
   0x1   :  { %9 = vsyncpa [#allocation3 + $0x1], 0  ;;  %s502_s9 = smov 0   ;;  %s504_s10 = smov 0  }
   0x2   :  { %s506_s11 = smov 0   ;;  %s508_s12 = smov 0  }
   0x3   :  { %s510_s13 = smov 0   ;;  %s512_s14 = smov 0  }
   0x4 LB: > { %s329_s15 = sadd.s32 4294967295, %s481_s14   ;;  %s330_s16 = sadd.s32 4294967294, %s481_s14   ;;  %s481_s14 = sphi %s512_s14, %s15_s14   ;;  %s477_s13 = sphi %s510_s13, %s626_s13   ;;  %s473_s12 = sphi %s508_s12, %s625_s12   ;;  %s469_s11 = sphi %s506_s11, %s624_s11   ;;  %s465_s10 = sphi %s504_s10, %s623_s10   ;;  %s461_s9 = sphi %s502_s9, %s622_s9  }
   0x5   : > { %s27_s17 = sadd.s32 1, %s477_s13  ;;  %s92_s18 = sadd.s32 1, %s469_s11 }
   0x6   : > { %p29_p0 = scmp.ge.s32.totalorder %s27_s17, 2  ;;  %p102_p1 = scmp.ne.s32.totalorder %s469_s11, %s465_s10 }
   0x7   : > { %p103_p2 = scmp.eq.s32.totalorder %s329_s15, 1  ;;  %p108_p3 = scmp.ne.s32.totalorder %s465_s10, %s461_s9 }
   0x8   : > { %s628_s17 = smov (%p29_p0, %s27_s17), 0  ;;  %p109_p5 = scmp.eq.s32.totalorder %s330_s16, 1 }
   0x9   : > { %p542_p4 = por %p103_p2, %p102_p1  ;;  %s87_s20 = ssub.s32 %s477_s13, %s628_s17 }
   0xa   : > { %p333_p6 = scmp.ge.s32.totalorder %s481_s14, 1  ;;  %p90_p7 = scmp.eq.s32.totalorder %s87_s20, 0 }
   0xb   : > { %p549_p8 = por %p109_p5, %p108_p3  ;;  %p147_p9 = scmp.lt.s32.totalorder %s481_s14, 3 }
   0xc   : > { %s555_s22 = scalar_select %p90_p7, %s469_s11, %s92_s18  }
   0xd   : > { %p148_p10 = pnand %p333_p6, %p147_p9 }
   0xe   : > { %p178_p11 = scmp.lt.s32.totalorder (!%p148_p10), %s473_s12, 1  ;;  %v197_v1 = vlaneseq (!%p148_p10)  ;;  %v483_v8 = vmov (!%p148_p10), 0   ;;  %v484_v12 = vmov (!%p148_p10), 1   ;;  %s485_s3 = smov (!%p148_p10), 1  }
   0xf   : > { %151 = sbr.rel (%p148_p10) target bundleno = 598 (0x256), region = 28  ;;  %399 = vset.pattern.permute.xlu1 (!%p148_p10), %v483_v8  ;;  %400 = vset.pattern.permute.xlu0 (!%p148_p10), %v484_v12  ;;  %s175_s4 = sand.u32 (!%p148_p10), 1, %s465_s10  }
  0x10   : > { %v198_v2 = vand.u32 (!%p148_p10), 127, %v197_v1  ;;  %s334_s5 = sshll.u32 (!%p148_p10), %s175_s4, 3  ;;  %s338_s6 = sshll.u32 (!%p148_p10), %s473_s12, 7 }
  0x11   : > { %s177_s7 = scalar_lea.vmem (!%p148_p10), [#allocation2], %s334_s5  ;;  %s570_s18 = scalar_lea.hbm (!%p148_p10), %s619_s2, %s338_s6 }
  0x12   : > { %vm199_vm0 = vcmp.lt.s32.totalorder (!%p148_p10), %v198_v2, 16  ;;  %s243_s8 = sshll.u32 (!%p148_p10), %s177_s7, 4  ;;  %s229_s20 = scalar_lea.sflag (!%p148_p10), [#allocation3], %s175_s4  ;;  %s572_s8 = int_to_ptr.vmem [resolvable:$true] %s243_s8 }
  0x16   : > { %s179_s23 = scalar_select %p178_p11, %s473_s12, 1 }
  0x17   : > { %s486_s12 = smov [#allocation2]  }
  0x18   : > { %s335_s24 = sshll.u32 %s179_s23, 3  ;;  %s403_s23 = scalar_lea.vmem %s572_s8, 128 }
  0x19   : > { %s184_s27 = scalar_lea.vmem %s617_s0, %s335_s24  ;;  %s191_s30 = scalar_lea.vmem %s618_s1, %s335_s24 }
  0x1a   : > { %v192_v0 = vld [vmem:[%s184_s27] sm:$0xff]  ;;  %p404_p12 = scmp.ne.s32.totalorder %s572_s8, %s403_s23  ;;  %s407_s24 = sshll.u32 %s486_s12, 4  ;;  %s408_s24 = int_to_ptr.vmem [resolvable:$false] %s407_s24 }
  0x1b   : > { %194 = vadd.xlane.f32.xlu0 %v192_v0  ;;  %v193_v13 = vld [vmem:[%s191_s30] sm:$0xff]  ;;  %s409_s25 = scalar_lea.vmem %s408_s24, 256  ;;  %p410_p1 = scmp.lt.s32.totalorder %s572_s8, %s408_s24 }
  0x1c   : > { %p405_p13 = pnand %p404_p12, %p542_p4  ;;  %p411_p2 = scmp.lt.s32.totalorder %s409_s25, %s403_s23 }
  0x1e   : > { %p406_p0 = pneg %p405_p13  ;;  %p412_p3 = por %p411_p2, %p410_p1 }
  0x20   : > { %p413_p5 = pnand %p412_p3, %p406_p0 }
  0xa8   : > { %v195_v3 = vpop.xlane.xlu0 %194 }
  0xa9   : > { %v196_v4 = vmul.f32 0.0625, %v195_v3 }
  0xab   : > { %v200_v5 = vsub.f32 %v192_v0, %v196_v4 }
  0xad   : > { %v201_v6 = vsel %vm199_vm0, %v200_v5, 0.0 }
  0xae   : > { %v202_v7 = vmul.f32 %v201_v6, %v201_v6 }
  0xb0   : > { %203 = vadd.xlane.f32.xlu0 %v202_v7 }
 0x13d   : > { %v204_v9 = vpop.xlane.xlu0 %203 }
 0x13e   : > { %v205_v10 = vmul.f32 0.0625, %v204_v9 }
 0x140   : > { %v206_v11 = vadd.f32 1e-05, %v205_v10 }
 0x142   : > { %401 = vrsqrt.f32 %v206_v11 }
 0x14c   : > { %v402_v14 = vpop.eup %401 }
 0x14d   : > { %v208_v15 = vmul.f32 %v402_v14, %v193_v13 }
 0x14f   : > { %v209_v16 = vmul.f32 %v208_v15, %v196_v4 }
 0x151   : > { %211 = vrot.lane.b32.xlu1 %v209_v16, %s485_s3 }
 0x155   : > { %217 = vperm.xlu1 %399, %v208_v15  }
 0x1c3   : > { %v212_v17 = vpop.permute.xlu1 %211 }
 0x1c4   : > { %v214_v18 = vsub.f32 %v193_v13, %v212_v17 }
 0x1c6   : > { %223 = vperm.xlu0 %400, %v214_v18  }
 0x1d4   : > { %v218_v19 = vpop.permute.xlu1 %217 }
 0x1d5   : > { %v220_v20 = vmul.f32 %v218_v19, %v192_v0 }
 0x245   : > { %v224_v21 = vpop.permute.xlu0 %223 }
 0x246   : > { %v226_v22 = vadd.f32 %v224_v21, %v220_v20 }
 0x248   : > { %227 = vst [vmem:[%s177_s7] sm:$0xff] %v226_v22 }
 0x249   : > { %416 = shalt.err (!%p413_p5)
}
 0x24a   : > { %s417_s26 = scalar_lea.hbm %s570_s18, 128  ;;  %s421_s29 = scalar_lea.hbm %s619_s2, 256 }
 0x24b   : > { %p418_p6 = scmp.ne.s32.totalorder %s570_s18, %s417_s26  ;;  %p422_p10 = scmp.lt.u32.totalorder %s570_s18, %s619_s2 }
 0x24c   : > { %p423_p11 = scmp.lt.u32.totalorder %s421_s29, %s417_s26  ;;  %p425_p13 = scmp.lt.u32.totalorder %s417_s26, %s570_s18 }
 0x24d   : > { %p419_p7 = pnand %p418_p6, %p542_p4 }
 0x24e   : > { %p424_p12 = por %p423_p11, %p422_p10 }
 0x24f   : > { %p420_p9 = pneg %p419_p7 }
 0x250   : > { %p426_p0 = por %p425_p13, %p424_p12 }
 0x252   : > { %p427_p1 = pnand %p426_p0, %p420_p9 }
 0x254   : > { %430 = shalt.err (!%p427_p1)
}
 0x255   : > { %341 = dma.vmem_to_hbm [thread:$0]  (%p542_p4), %s572_s8, 128, %s570_s18, %s229_s20  }
 0x256 PF: > { %p347_p2 = scmp.ge.s32.totalorder %s481_s14, 2  ;;  %s255_s4 = sand.u32 1, %s461_s9  }
 0x257   : > { %s256_s5 = scalar_lea.sflag [#allocation3], %s255_s4 }
 0x258   : > { %p344_p3 = pnand %p347_p2, %p549_p8 }
 0x25a   : > { %456 = dma.done.wait (!%p344_p3), %s256_s5, 128  }
 0x25b   : > { %458 = vsyncadd (!%p344_p3), %s256_s5, 4294967168  ;;  %s15_s14 = sadd.s32 1, %s481_s14   ;;  %s622_s9 = smov %s465_s10 }
 0x25c   : > { %p12_p5 = scmp.ge.s32.totalorder %s15_s14, 4   ;;  %s623_s10 = smov %s469_s11 }
 0x25d   : > { %s624_s11 = smov %s555_s22  ;;  %s625_s12 = smov %s477_s13 }
 0x25e   : > { %s626_s13 = smov %s628_s17  ;;  %14 = sbr.rel (!%p12_p5) target bundleno = 4 (0x4), region = 66 }
 0x265   :  { %261 = vsyncpa [#allocation3], 1 }
 0x266   :  { %263 = vsyncpa [#allocation3 + $0x1], 1 }

</bundles_post_ra>
